<compile_context>
chip_gen: v6e
topology: v6e:2x2x1
jax: 0.10.0
libtpu: 0.0.40
codegen_flags: <defaults>
</compile_context>

<pallas_src>
import functools
import math

import jax
import jax.numpy as jnp
from jax import lax
from jax.experimental import pallas as pl
from jax.experimental.pallas import tpu as pltpu


def _pick_tile(dim, candidates=(256, 128)):
    """Largest candidate tile that divides `dim`, else the full dim (always legal)."""
    for c in candidates:
        if dim % c == 0:
            return c
    return dim


# ---------------------------------------------------------------------------
# Tiled linear: y = x @ w + b   (bf16 MXU operands, f32 accumulation)
# ---------------------------------------------------------------------------
def _matmul_bias_kernel(x_ref, w_ref, b_ref, o_ref, acc_ref):
    # grid = (j over N tiles, i over M tiles, k over K tiles); k is the reduction.
    @pl.when(pl.program_id(2) == 0)
    def _():
        acc_ref[...] = jnp.zeros_like(acc_ref)

    acc_ref[...] += jnp.dot(x_ref[...], w_ref[...],
                            preferred_element_type=jnp.float32)

    @pl.when(pl.program_id(2) == pl.num_programs(2) - 1)
    def _():
        o_ref[...] = (acc_ref[...] + b_ref[...]).astype(o_ref.dtype)


def linear(x, w, b, out_dtype=jnp.float32):
    """x: (M, K); w: (K, N) (= torch_weight.T); b: (N,)."""
    M, K = x.shape
    N = w.shape[1]
    x = x.astype(jnp.bfloat16)
    w = w.astype(jnp.bfloat16)
    b = b.astype(jnp.float32).reshape(1, N)

    tm = _pick_tile(M)
    tn = _pick_tile(N)
    # Keep full K resident when moderate (weight column block then stays resident
    # across the whole inner M sweep); otherwise K-tile so VMEM is bounded.
    tk = K if K <= 1024 else _pick_tile(K, (512, 256, 128))

    grid = (N // tn, M // tm, K // tk)   # N outermost, reduction innermost

    return pl.pallas_call(
        _matmul_bias_kernel,
        out_shape=jax.ShapeDtypeStruct((M, N), out_dtype),
        grid=grid,
        in_specs=[
            pl.BlockSpec((tm, tk), lambda j, i, k: (i, k)),
            pl.BlockSpec((tk, tn), lambda j, i, k: (k, j)),
            pl.BlockSpec((1, tn), lambda j, i, k: (0, j)),
        ],
        out_specs=pl.BlockSpec((tm, tn), lambda j, i, k: (i, j)),
        scratch_shapes=[pltpu.VMEM((tm, tn), jnp.float32)],
        compiler_params=pltpu.CompilerParams(
            dimension_semantics=("parallel", "parallel", "arbitrary")),
    )(x, w, b)


# ---------------------------------------------------------------------------
# Attention: one (batch, head, q-tile) per grid step; head-major blocks
# ---------------------------------------------------------------------------
def _attention_kernel(inv_scale, q_ref, k_ref, v_ref, attn_ref, ctx_ref):
    # q: (tq, hd) bf16; k/v: (S, hd) bf16; attn: (tq, S) f32; ctx: (tq, hd) bf16
    q = q_ref[...] * inv_scale                      # scale folded into the small Q operand (stays bf16)
    s = lax.dot_general(q, k_ref[...], (((1,), (1,)), ((), ())),
                        preferred_element_type=jnp.float32)          # (tq, S), no materialized K.T
    m = jnp.max(s, axis=-1, keepdims=True)
    e = jnp.exp(s - m)
    l = jnp.sum(e, axis=-1, keepdims=True)
    p = e / l                                       # exact softmax for the returned probabilities
    attn_ref[...] = p.astype(attn_ref.dtype)
    ctx_ref[...] = jnp.dot(p.astype(jnp.bfloat16), v_ref[...],
                           preferred_element_type=jnp.float32).astype(ctx_ref.dtype)


def _attention(q4, k4, v4, inv_scale, attn_dtype=jnp.float32):
    """q4/k4/v4: (B, H, S, hd) bf16. Returns attn (B,H,S,S) and ctx (B,H,S,hd) bf16."""
    B, H, S, hd = q4.shape
    tq = _pick_tile(S, (512, 256, 128))
    kern = functools.partial(_attention_kernel, inv_scale)
    kv_spec = pl.BlockSpec((None, None, S, hd), lambda b, h, i: (b, h, 0, 0))
    return pl.pallas_call(
        kern,
        out_shape=(
            jax.ShapeDtypeStruct((B, H, S, S), attn_dtype),
            jax.ShapeDtypeStruct((B, H, S, hd), jnp.bfloat16),
        ),
        grid=(B, H, S // tq),
        in_specs=[
            pl.BlockSpec((None, None, tq, hd), lambda b, h, i: (b, h, i, 0)),
            kv_spec,
            kv_spec,
        ],
        out_specs=(
            pl.BlockSpec((None, None, tq, S), lambda b, h, i: (b, h, i, 0)),
            pl.BlockSpec((None, None, tq, hd), lambda b, h, i: (b, h, i, 0)),
        ),
        compiler_params=pltpu.CompilerParams(
            dimension_semantics=("parallel", "parallel", "parallel")),
    )(q4, k4, v4)


# ---------------------------------------------------------------------------
# MultiHeadAttention forward
# ---------------------------------------------------------------------------
def multi_head_attention(query, key, value, params, n_head, attn_dtype=jnp.float32):
    B, S, D = query.shape
    hd = D // n_head
    xq = query.reshape(B * S, D)

    if (query is key) and (query is value):
        # Self-attention fast path: one (D, 3D) matmul (wq|wk|wv packed on N).
        w_qkv = jnp.concatenate([params["wq"], params["wk"], params["wv"]], axis=1)
        b_qkv = jnp.concatenate([params["bq"], params["bk"], params["bv"]], axis=0)
        qkv = linear(xq, w_qkv, b_qkv, out_dtype=jnp.bfloat16)        # (B*S, 3D)
        q2, k2, v2 = qkv[:, :D], qkv[:, D:2 * D], qkv[:, 2 * D:]
    else:
        q2 = linear(xq, params["wq"], params["bq"], out_dtype=jnp.bfloat16)
        k2 = linear(key.reshape(B * S, D), params["wk"], params["bk"],
                    out_dtype=jnp.bfloat16)
        v2 = linear(value.reshape(B * S, D), params["wv"], params["bv"],
                    out_dtype=jnp.bfloat16)

    # Head-major layout (B, H, S, hd) so attention blocks are clean full-lane tiles.
    def to_heads(x2):
        return x2.reshape(B, S, n_head, hd).transpose(0, 2, 1, 3)

    q4, k4, v4 = to_heads(q2), to_heads(k2), to_heads(v2)

    # torch: scale = sqrt(d_model); scores / sqrt(scale) == scores * d_model**-0.25
    inv_scale = 1.0 / math.sqrt(math.sqrt(float(D)))
    attn, ctx4 = _attention(q4, k4, v4, inv_scale, attn_dtype=attn_dtype)

    ctx2 = ctx4.transpose(0, 2, 1, 3).reshape(B * S, D)               # merge heads
    out = linear(ctx2, params["wo"], params["bo"], out_dtype=jnp.float32)
    return out.reshape(B, S, D), attn


# ---------------------------------------------------------------------------
# Pure-JAX f32 reference (for correctness checking) and param init
# ---------------------------------------------------------------------------
def multi_head_attention_ref(query, key, value, params, n_head):
    B, S, D = query.shape
    hd = D // n_head

    def lin(x, w, b):
        return x @ w + b

    def heads(x):
        return x.reshape(B, S, n_head, hd).transpose(0, 2, 1, 3)

    Q = heads(lin(query, params["wq"], params["bq"]))
    K = heads(lin(key, params["wk"], params["bk"]))
    V = heads(lin(value, params["wv"], params["bv"]))
    scores = jnp.einsum("bhqd,bhkd->bhqk", Q, K) / math.sqrt(math.sqrt(float(D)))
    attn = jax.nn.softmax(scores, axis=-1)
    x = jnp.einsum("bhqk,bhkd->bhqd", attn, V)
    x = x.transpose(0, 2, 1, 3).reshape(B, S, D)
    return x @ params["wo"] + params["bo"], attn


def init_params(key, d_model):
    """Deterministic init. Weights stored as (D_in, D_out) = torch_weight.T."""
    ks = jax.random.split(key, 8)
    bound = 1.0 / math.sqrt(d_model)

    def u(k, shape):
        return jax.random.uniform(k, shape, jnp.float32, -bound, bound)

    return {
        "wq": u(ks[0], (d_model, d_model)), "bq": u(ks[1], (d_model,)),
        "wk": u(ks[2], (d_model, d_model)), "bk": u(ks[3], (d_model,)),
        "wv": u(ks[4], (d_model, d_model)), "bv": u(ks[5], (d_model,)),
        "wo": u(ks[6], (d_model, d_model)), "bo": u(ks[7], (d_model,)),
    }


if __name__ == "__main__":
    B, S, d_model, n_head = 2, 8, 32, 4

    root = jax.random.PRNGKey(0)
    k_q, k_k, k_v, k_p = jax.random.split(root, 4)
    query = jax.random.normal(k_q, (B, S, d_model), jnp.float32)
    key_x = jax.random.normal(k_k, (B, S, d_model), jnp.float32)
    value = jax.random.normal(k_v, (B, S, d_model), jnp.float32)
    params = init_params(k_p, d_model)

    # General (cross-attention) path.
    mha = jax.jit(functools.partial(multi_head_attention, n_head=n_head))
    out, attn = mha(query, key_x, value, params)
    jax.block_until_ready((out, attn))

    assert out.shape == (B, S, d_model)
    assert attn.shape == (B, n_head, S, S)

    # Exact softmax: rows sum to 1 to f32 precision.
    row_sums = jnp.sum(attn, axis=-1)
    assert bool(jnp.all(jnp.abs(row_sums - 1.0) < 1e-3))

    # Numerics vs pure-JAX f32 reference (bf16 MXU operands -> loose tolerance).
    out_ref, attn_ref = multi_head_attention_ref(query, key_x, value, params, n_head)
    assert bool(jnp.all(jnp.abs(out - out_ref) < 5e-2))
    assert bool(jnp.all(jnp.abs(attn - attn_ref) < 2e-2))

    # Self-attention fast path (packed (D, 3D) weight matmul).
    mha_self = jax.jit(lambda x, p: multi_head_attention(x, x, x, p, n_head))
    out_s, attn_s = mha_self(query, params)
    jax.block_until_ready((out_s, attn_s))
    out_s_ref, attn_s_ref = multi_head_attention_ref(query, query, query, params, n_head)
    assert bool(jnp.all(jnp.abs(out_s - out_s_ref) < 5e-2))
    assert bool(jnp.all(jnp.abs(attn_s - attn_s_ref) < 2e-2))

    print("KERNEL_OK")
</pallas_src>

<mosaic_0001>
module attributes {stable_mosaic.version = 11 : i64} {
  func.func @_matmul_bias_kernel(%arg0: i32, %arg1: i32, %arg2: i32, %arg3: memref<16x32xbf16, #tpu.memory_space<vmem>>, %arg4: memref<32x32xbf16, #tpu.memory_space<vmem>>, %arg5: memref<1x32xf32, #tpu.memory_space<vmem>>, %arg6: memref<16x32xbf16, #tpu.memory_space<vmem>>, %arg7: memref<16x32xf32, #tpu.memory_space<vmem>>) attributes {dimension_semantics = [#tpu.dimension_semantics<parallel>, #tpu.dimension_semantics<parallel>, #tpu.dimension_semantics<arbitrary>], iteration_bounds = array<i64: 1, 1, 1>, scalar_prefetch = 0 : i64, scratch_operands = 1 : i64, tpu.core_type = #tpu.core_type<tc>, window_params = [{transform_indices = @transform_0, window_bounds = array<i64: 16, 32>}, {transform_indices = @transform_1, window_bounds = array<i64: 32, 32>}, {transform_indices = @transform_2, window_bounds = array<i64: 1, 32>}, {transform_indices = @transform_3, window_bounds = array<i64: 16, 32>}]} {
    %c0_i32 = arith.constant 0 : i32
    %0 = arith.cmpi eq, %arg2, %c0_i32 : i32
    %1 = arith.extui %0 : i1 to i32
    %c0_i32_0 = arith.constant 0 : i32
    %2 = arith.cmpi ne, %1, %c0_i32_0 : i32
    scf.if %2 {
      %cst_10 = arith.constant 0.000000e+00 : f32
      %12 = vector.broadcast %cst_10 : f32 to vector<16x32xf32>
      %c0_11 = arith.constant 0 : index
      %c0_12 = arith.constant 0 : index
      %13 = vector.load %arg7[%c0_11, %c0_12] : memref<16x32xf32, #tpu.memory_space<vmem>>, vector<16x32xf32>
      tpu.vector_store %arg7[%c0_11, %c0_12], %12 {strides = array<i32>} : memref<16x32xf32, #tpu.memory_space<vmem>>, vector<16x32xf32>,
    } else {
    }
    %c0 = arith.constant 0 : index
    %c0_1 = arith.constant 0 : index
    %3 = vector.load %arg7[%c0, %c0_1] : memref<16x32xf32, #tpu.memory_space<vmem>>, vector<16x32xf32>
    %c0_2 = arith.constant 0 : index
    %c0_3 = arith.constant 0 : index
    %4 = vector.load %arg3[%c0_2, %c0_3] : memref<16x32xbf16, #tpu.memory_space<vmem>>, vector<16x32xbf16>
    %c0_4 = arith.constant 0 : index
    %c0_5 = arith.constant 0 : index
    %5 = vector.load %arg4[%c0_4, %c0_5] : memref<32x32xbf16, #tpu.memory_space<vmem>>, vector<32x32xbf16>
    %cst = arith.constant dense<0.000000e+00> : vector<16x32xf32>
    %6 = tpu.matmul %4, %5, %cst {dimension_numbers = #tpu.dot_dimension_numbers<[1], [0], [0], [1], [0, 0, 1, 1], [], []>} : vector<16x32xbf16>, vector<32x32xbf16>, vector<16x32xf32> -> vector<16x32xf32>
    %7 = arith.addf %3, %6 : vector<16x32xf32>
    %c0_6 = arith.constant 0 : index
    %c0_7 = arith.constant 0 : index
    %8 = vector.load %arg7[%c0_6, %c0_7] : memref<16x32xf32, #tpu.memory_space<vmem>>, vector<16x32xf32>
    tpu.vector_store %arg7[%c0_6, %c0_7], %7 {strides = array<i32>} : memref<16x32xf32, #tpu.memory_space<vmem>>, vector<16x32xf32>,
    %c0_i32_8 = arith.constant 0 : i32
    %9 = arith.cmpi eq, %arg2, %c0_i32_8 : i32
    %10 = arith.extui %9 : i1 to i32
    %c0_i32_9 = arith.constant 0 : i32
    %11 = arith.cmpi ne, %10, %c0_i32_9 : i32
    scf.if %11 {
      %c0_10 = arith.constant 0 : index
      %c0_11 = arith.constant 0 : index
      %12 = vector.load %arg7[%c0_10, %c0_11] : memref<16x32xf32, #tpu.memory_space<vmem>>, vector<16x32xf32>
      %c0_12 = arith.constant 0 : index
      %c0_13 = arith.constant 0 : index
      %13 = vector.load %arg5[%c0_12, %c0_13] : memref<1x32xf32, #tpu.memory_space<vmem>>, vector<1x32xf32>
      %14 = vector.broadcast %13 : vector<1x32xf32> to vector<16x32xf32>
      %15 = arith.addf %12, %14 : vector<16x32xf32>
      %16 = arith.truncf %15 : vector<16x32xf32> to vector<16x32xbf16>
      %c0_14 = arith.constant 0 : index
      %c0_15 = arith.constant 0 : index
      %17 = vector.load %arg6[%c0_14, %c0_15] : memref<16x32xbf16, #tpu.memory_space<vmem>>, vector<16x32xbf16>
      tpu.vector_store %arg6[%c0_14, %c0_15], %16 {strides = array<i32>} : memref<16x32xbf16, #tpu.memory_space<vmem>>, vector<16x32xbf16>,
    } else {
    }
    return
  }
  func.func @transform_0(%arg0: i32, %arg1: i32, %arg2: i32) -> (i32, i32) {
    %c0_i32 = arith.constant 0 : i32
    return %arg1, %arg2 : i32, i32
  }
  func.func @transform_1(%arg0: i32, %arg1: i32, %arg2: i32) -> (i32, i32) {
    %c0_i32 = arith.constant 0 : i32
    return %arg2, %arg0 : i32, i32
  }
  func.func @transform_2(%arg0: i32, %arg1: i32, %arg2: i32) -> (i32, i32) {
    %c0_i32 = arith.constant 0 : i32
    %c0_i32_0 = arith.constant 0 : i32
    return %c0_i32, %arg0 : i32, i32
  }
  func.func @transform_3(%arg0: i32, %arg1: i32, %arg2: i32) -> (i32, i32) {
    %c0_i32 = arith.constant 0 : i32
    return %arg1, %arg0 : i32, i32
  }
}

module attributes {stable_mosaic.version = 11 : i64} {
  func.func @_attention_kernel(%arg0: i32, %arg1: i32, %arg2: i32, %arg3: memref<1x1x8x8xbf16, #tpu.memory_space<vmem>>, %arg4: memref<1x1x8x8xbf16, #tpu.memory_space<vmem>>, %arg5: memref<1x1x8x8xbf16, #tpu.memory_space<vmem>>, %arg6: memref<1x1x8x8xf32, #tpu.memory_space<vmem>>, %arg7: memref<1x1x8x8xbf16, #tpu.memory_space<vmem>>) attributes {dimension_semantics = [#tpu.dimension_semantics<parallel>, #tpu.dimension_semantics<parallel>, #tpu.dimension_semantics<parallel>], iteration_bounds = array<i64: 2, 4, 1>, scalar_prefetch = 0 : i64, scratch_operands = 0 : i64, tpu.core_type = #tpu.core_type<tc>, window_params = [{transform_indices = @transform_0, window_bounds = array<i64: 1, 1, 8, 8>}, {transform_indices = @transform_1, window_bounds = array<i64: 1, 1, 8, 8>}, {transform_indices = @transform_2, window_bounds = array<i64: 1, 1, 8, 8>}, {transform_indices = @transform_3, window_bounds = array<i64: 1, 1, 8, 8>}, {transform_indices = @transform_4, window_bounds = array<i64: 1, 1, 8, 8>}]} {
    %c0 = arith.constant 0 : index
    %c0_0 = arith.constant 0 : index
    %c0_1 = arith.constant 0 : index
    %c0_2 = arith.constant 0 : index
    %0 = vector.load %arg3[%c0, %c0_0, %c0_1, %c0_2] : memref<1x1x8x8xbf16, #tpu.memory_space<vmem>>, vector<1x1x8x8xbf16>
    %1 = vector.shape_cast %0 : vector<1x1x8x8xbf16> to vector<8x8xbf16>
    %cst = arith.constant 4.199220e-01 : bf16
    %2 = vector.broadcast %cst : bf16 to vector<8x8xbf16>
    %3 = arith.mulf %1, %2 : vector<8x8xbf16>
    %c0_3 = arith.constant 0 : index
    %c0_4 = arith.constant 0 : index
    %c0_5 = arith.constant 0 : index
    %c0_6 = arith.constant 0 : index
    %4 = vector.load %arg4[%c0_3, %c0_4, %c0_5, %c0_6] : memref<1x1x8x8xbf16, #tpu.memory_space<vmem>>, vector<1x1x8x8xbf16>
    %5 = vector.shape_cast %4 : vector<1x1x8x8xbf16> to vector<8x8xbf16>
    %cst_7 = arith.constant dense<0.000000e+00> : vector<8x8xf32>
    %6 = tpu.matmul %3, %5, %cst_7 {dimension_numbers = #tpu.dot_dimension_numbers<[1], [1], [0], [0], [0, 0, 1, 0], [], []>} : vector<8x8xbf16>, vector<8x8xbf16>, vector<8x8xf32> -> vector<8x8xf32>
    %cst_8 = arith.constant dense<0xFF800000> : vector<8xf32>
    %7 = vector.multi_reduction <maximumf>, %6, %cst_8 [1] : vector<8x8xf32> to vector<8xf32>
    %8 = vector.shape_cast %7 : vector<8xf32> to vector<8x1xf32>
    %9 = vector.broadcast %8 : vector<8x1xf32> to vector<8x8xf32>
    %10 = arith.subf %6, %9 : vector<8x8xf32>
    %11 = math.exp %10 : vector<8x8xf32>
    %cst_9 = arith.constant dense<0.000000e+00> : vector<8xf32>
    %12 = vector.multi_reduction <add>, %11, %cst_9 [1] : vector<8x8xf32> to vector<8xf32>
    %13 = vector.shape_cast %12 : vector<8xf32> to vector<8x1xf32>
    %14 = vector.broadcast %13 : vector<8x1xf32> to vector<8x8xf32>
    %15 = arith.divf %11, %14 : vector<8x8xf32>
    %c0_10 = arith.constant 0 : index
    %c0_11 = arith.constant 0 : index
    %c0_12 = arith.constant 0 : index
    %c0_13 = arith.constant 0 : index
    %16 = vector.load %arg6[%c0_10, %c0_11, %c0_12, %c0_13] : memref<1x1x8x8xf32, #tpu.memory_space<vmem>>, vector<1x1x8x8xf32>
    %17 = vector.shape_cast %16 : vector<1x1x8x8xf32> to vector<8x8xf32>
    %18 = vector.shape_cast %15 : vector<8x8xf32> to vector<1x1x8x8xf32>
    tpu.vector_store %arg6[%c0_10, %c0_11, %c0_12, %c0_13], %18 {strides = array<i32>} : memref<1x1x8x8xf32, #tpu.memory_space<vmem>>, vector<1x1x8x8xf32>,
    %19 = arith.truncf %15 : vector<8x8xf32> to vector<8x8xbf16>
    %c0_14 = arith.constant 0 : index
    %c0_15 = arith.constant 0 : index
    %c0_16 = arith.constant 0 : index
    %c0_17 = arith.constant 0 : index
    %20 = vector.load %arg5[%c0_14, %c0_15, %c0_16, %c0_17] : memref<1x1x8x8xbf16, #tpu.memory_space<vmem>>, vector<1x1x8x8xbf16>
    %21 = vector.shape_cast %20 : vector<1x1x8x8xbf16> to vector<8x8xbf16>
    %cst_18 = arith.constant dense<0.000000e+00> : vector<8x8xf32>
    %22 = tpu.matmul %19, %21, %cst_18 {dimension_numbers = #tpu.dot_dimension_numbers<[1], [0], [0], [1], [0, 0, 1, 1], [], []>} : vector<8x8xbf16>, vector<8x8xbf16>, vector<8x8xf32> -> vector<8x8xf32>
    %23 = arith.truncf %22 : vector<8x8xf32> to vector<8x8xbf16>
    %c0_19 = arith.constant 0 : index
    %c0_20 = arith.constant 0 : index
    %c0_21 = arith.constant 0 : index
    %c0_22 = arith.constant 0 : index
    %24 = vector.load %arg7[%c0_19, %c0_20, %c0_21, %c0_22] : memref<1x1x8x8xbf16, #tpu.memory_space<vmem>>, vector<1x1x8x8xbf16>
    %25 = vector.shape_cast %24 : vector<1x1x8x8xbf16> to vector<8x8xbf16>
    %26 = vector.shape_cast %23 : vector<8x8xbf16> to vector<1x1x8x8xbf16>
    tpu.vector_store %arg7[%c0_19, %c0_20, %c0_21, %c0_22], %26 {strides = array<i32>} : memref<1x1x8x8xbf16, #tpu.memory_space<vmem>>, vector<1x1x8x8xbf16>,
    return
  }
  func.func @transform_0(%arg0: i32, %arg1: i32, %arg2: i32) -> (i32, i32, i32, i32) {
    %c0_i32 = arith.constant 0 : i32
    %c0_i32_0 = arith.constant 0 : i32
    return %arg0, %arg1, %arg2, %c0_i32 : i32, i32, i32, i32
  }
  func.func @transform_1(%arg0: i32, %arg1: i32, %arg2: i32) -> (i32, i32, i32, i32) {
    %c0_i32 = arith.constant 0 : i32
    %c0_i32_0 = arith.constant 0 : i32
    %c0_i32_1 = arith.constant 0 : i32
    return %arg0, %arg1, %c0_i32, %c0_i32_0 : i32, i32, i32, i32
  }
  func.func @transform_2(%arg0: i32, %arg1: i32, %arg2: i32) -> (i32, i32, i32, i32) {
    %c0_i32 = arith.constant 0 : i32
    %c0_i32_0 = arith.constant 0 : i32
    %c0_i32_1 = arith.constant 0 : i32
    return %arg0, %arg1, %c0_i32, %c0_i32_0 : i32, i32, i32, i32
  }
  func.func @transform_3(%arg0: i32, %arg1: i32, %arg2: i32) -> (i32, i32, i32, i32) {
    %c0_i32 = arith.constant 0 : i32
    %c0_i32_0 = arith.constant 0 : i32
    return %arg0, %arg1, %arg2, %c0_i32 : i32, i32, i32, i32
  }
  func.func @transform_4(%arg0: i32, %arg1: i32, %arg2: i32) -> (i32, i32, i32, i32) {
    %c0_i32 = arith.constant 0 : i32
    %c0_i32_0 = arith.constant 0 : i32
    return %arg0, %arg1, %arg2, %c0_i32 : i32, i32, i32, i32
  }
}

module attributes {stable_mosaic.version = 11 : i64} {
  func.func @_matmul_bias_kernel(%arg0: i32, %arg1: i32, %arg2: i32, %arg3: memref<16x32xbf16, #tpu.memory_space<vmem>>, %arg4: memref<32x32xbf16, #tpu.memory_space<vmem>>, %arg5: memref<1x32xf32, #tpu.memory_space<vmem>>, %arg6: memref<16x32xf32, #tpu.memory_space<vmem>>, %arg7: memref<16x32xf32, #tpu.memory_space<vmem>>) attributes {dimension_semantics = [#tpu.dimension_semantics<parallel>, #tpu.dimension_semantics<parallel>, #tpu.dimension_semantics<arbitrary>], iteration_bounds = array<i64: 1, 1, 1>, scalar_prefetch = 0 : i64, scratch_operands = 1 : i64, tpu.core_type = #tpu.core_type<tc>, window_params = [{transform_indices = @transform_0, window_bounds = array<i64: 16, 32>}, {transform_indices = @transform_1, window_bounds = array<i64: 32, 32>}, {transform_indices = @transform_2, window_bounds = array<i64: 1, 32>}, {transform_indices = @transform_3, window_bounds = array<i64: 16, 32>}]} {
    %c0_i32 = arith.constant 0 : i32
    %0 = arith.cmpi eq, %arg2, %c0_i32 : i32
    %1 = arith.extui %0 : i1 to i32
    %c0_i32_0 = arith.constant 0 : i32
    %2 = arith.cmpi ne, %1, %c0_i32_0 : i32
    scf.if %2 {
      %cst_10 = arith.constant 0.000000e+00 : f32
      %12 = vector.broadcast %cst_10 : f32 to vector<16x32xf32>
      %c0_11 = arith.constant 0 : index
      %c0_12 = arith.constant 0 : index
      %13 = vector.load %arg7[%c0_11, %c0_12] : memref<16x32xf32, #tpu.memory_space<vmem>>, vector<16x32xf32>
      tpu.vector_store %arg7[%c0_11, %c0_12], %12 {strides = array<i32>} : memref<16x32xf32, #tpu.memory_space<vmem>>, vector<16x32xf32>,
    } else {
    }
    %c0 = arith.constant 0 : index
    %c0_1 = arith.constant 0 : index
    %3 = vector.load %arg7[%c0, %c0_1] : memref<16x32xf32, #tpu.memory_space<vmem>>, vector<16x32xf32>
    %c0_2 = arith.constant 0 : index
    %c0_3 = arith.constant 0 : index
    %4 = vector.load %arg3[%c0_2, %c0_3] : memref<16x32xbf16, #tpu.memory_space<vmem>>, vector<16x32xbf16>
    %c0_4 = arith.constant 0 : index
    %c0_5 = arith.constant 0 : index
    %5 = vector.load %arg4[%c0_4, %c0_5] : memref<32x32xbf16, #tpu.memory_space<vmem>>, vector<32x32xbf16>
    %cst = arith.constant dense<0.000000e+00> : vector<16x32xf32>
    %6 = tpu.matmul %4, %5, %cst {dimension_numbers = #tpu.dot_dimension_numbers<[1], [0], [0], [1], [0, 0, 1, 1], [], []>} : vector<16x32xbf16>, vector<32x32xbf16>, vector<16x32xf32> -> vector<16x32xf32>
    %7 = arith.addf %3, %6 : vector<16x32xf32>
    %c0_6 = arith.constant 0 : index
    %c0_7 = arith.constant 0 : index
    %8 = vector.load %arg7[%c0_6, %c0_7] : memref<16x32xf32, #tpu.memory_space<vmem>>, vector<16x32xf32>
    tpu.vector_store %arg7[%c0_6, %c0_7], %7 {strides = array<i32>} : memref<16x32xf32, #tpu.memory_space<vmem>>, vector<16x32xf32>,
    %c0_i32_8 = arith.constant 0 : i32
    %9 = arith.cmpi eq, %arg2, %c0_i32_8 : i32
    %10 = arith.extui %9 : i1 to i32
    %c0_i32_9 = arith.constant 0 : i32
    %11 = arith.cmpi ne, %10, %c0_i32_9 : i32
    scf.if %11 {
      %c0_10 = arith.constant 0 : index
      %c0_11 = arith.constant 0 : index
      %12 = vector.load %arg7[%c0_10, %c0_11] : memref<16x32xf32, #tpu.memory_space<vmem>>, vector<16x32xf32>
      %c0_12 = arith.constant 0 : index
      %c0_13 = arith.constant 0 : index
      %13 = vector.load %arg5[%c0_12, %c0_13] : memref<1x32xf32, #tpu.memory_space<vmem>>, vector<1x32xf32>
      %14 = vector.broadcast %13 : vector<1x32xf32> to vector<16x32xf32>
      %15 = arith.addf %12, %14 : vector<16x32xf32>
      %c0_14 = arith.constant 0 : index
      %c0_15 = arith.constant 0 : index
      %16 = vector.load %arg6[%c0_14, %c0_15] : memref<16x32xf32, #tpu.memory_space<vmem>>, vector<16x32xf32>
      tpu.vector_store %arg6[%c0_14, %c0_15], %15 {strides = array<i32>} : memref<16x32xf32, #tpu.memory_space<vmem>>, vector<16x32xf32>,
    } else {
    }
    return
  }
  func.func @transform_0(%arg0: i32, %arg1: i32, %arg2: i32) -> (i32, i32) {
    %c0_i32 = arith.constant 0 : i32
    return %arg1, %arg2 : i32, i32
  }
  func.func @transform_1(%arg0: i32, %arg1: i32, %arg2: i32) -> (i32, i32) {
    %c0_i32 = arith.constant 0 : i32
    return %arg2, %arg0 : i32, i32
  }
  func.func @transform_2(%arg0: i32, %arg1: i32, %arg2: i32) -> (i32, i32) {
    %c0_i32 = arith.constant 0 : i32
    %c0_i32_0 = arith.constant 0 : i32
    return %c0_i32, %arg0 : i32, i32
  }
  func.func @transform_3(%arg0: i32, %arg1: i32, %arg2: i32) -> (i32, i32) {
    %c0_i32 = arith.constant 0 : i32
    return %arg1, %arg0 : i32, i32
  }
}

</mosaic_0001>

<bundles_post_ra>
// kernel: multi_head_attention.6
= control target key start
LH: loop header
LB: loop body
LE: loop exit
PB: predicated region body
PF: predicated region fallthrough
CT: control target
= control target key end

     0   :  { %vm19_vm0 = vcmask 261120   ;;  %v150_v0 = vmov 0.0   ;;  %vm151_vm1 = vmmov 0   ;;  %vm118_vm2 = vcmask 257024   ;;  %s195_s1 = inlined_call_operand.vmem [shape: bf16[32,32], index: 1, kind: input, shape index: {}]   ;;  %s196_s0 = inlined_call_operand.vmem [shape: bf16[16,32], index: 0, kind: input, shape index: {}]   ;;  %s197_s2 = inlined_call_operand.vmem [shape: f32[1,32], index: 2, kind: input, shape index: {}]   ;;  %s198_s3 = inlined_call_operand.vmem [shape: bf16[16,32], index: 3, kind: output, shape index: {}]  }
   0x1   :  { %137 = vmatprep.subr.bf16.mxu0 %v150_v0  ;;  %v147_v1 = vld [vmem:[%s195_s1 + $0x8] sm:$0xff]   ;;  %141 = vmatprep.mubr.msk.bf16.mxu0 %vm151_vm1, %v150_v0  ;;  %20 = vst.msk [vmem:[#allocation2] sm:$0xff] %vm19_vm0, %v150_v0  ;;  %21 = vst.msk [vmem:[#allocation2 + $0x8] sm:$0xff] %vm19_vm0, %v150_v0  ;;  %v148_v2 = vld [vmem:[%s195_s1] sm:$0xff]  }
   0x2   :  { %138 = vmatpush3.bf16.msra.mxu0 %v147_v1  ;;  %v149_v3 = vld [vmem:[%s196_s0] sm:$0xff]  }
   0x3   :  { %139 = vmatprep.subr.bf16.mxu0 %v150_v0  ;;  %v129_v12 = vld [vmem:[%s197_s2] ss:$0 sm:$0xff] }
   0x6   :  { %140 = vmatpush3.bf16.msra.mxu0 %v148_v2 }
   0x8   :  { %v22_v4 = vld [vmem:[#allocation2] sm:$0xff]  ;;  %v23_v8 = vld [vmem:[#allocation2 + $0x8] sm:$0xff] }
   0x9   :  { %142 = vmatmul.mubr.msk.bf16.vlgmr.msra.gmra.mxu0 %vm19_vm0, %v149_v3 }
  0xc9   :  { %v85_v5 = vpop.f32.mrf.mxu0 }
  0xca   :  { %v92_v6 = vadd.f32 %v85_v5, %v22_v4 }
  0xcb   :  { %v143_v7 = vpop.f32.mrf.mxu0 }
  0xcc   :  { %94 = vst.msk [vmem:[#allocation2] sm:$0xff] %vm19_vm0, %v92_v6 }
  0xcd   :  { %v88_v9 = vpop.f32.mrf.mxu0 }
  0xce   :  { %v93_v10 = vadd.f32 %v88_v9, %v23_v8 }
  0xcf   :  { %v144_v11 = vpop.f32.mrf.mxu0 }
  0xd0   :  { %95 = vst.msk [vmem:[#allocation2 + $0x8] sm:$0xff] %vm19_vm0, %v93_v10 }
  0xd3   :  { %v99_v13 = vld [vmem:[#allocation2] sm:$0xff] }
  0xd4   :  { %v108_v14 = vadd.f32 %v129_v12, %v99_v13 }
  0xd6   :  { %v132_v15 = vpack.c.bf16 %v108_v14, %v108_v14 }
  0xd7   :  { %v100_v16 = vld [vmem:[#allocation2 + $0x8] sm:$0xff] }
  0xd8   :  { %119 = vst.msk [vmem:[%s198_s3] sm:$0xf] %vm118_vm2, %v132_v15  ;;  %v109_v17 = vadd.f32 %v129_v12, %v100_v16 }
  0xda   :  { %v133_v18 = vpack.c.bf16 %v109_v17, %v109_v17 }
  0xdc   :  { %120 = vst.msk [vmem:[%s198_s3 + $0x4] sm:$0xf] %vm118_vm2, %v133_v18 }

// kernel: multi_head_attention.8
= control target key start
LH: loop header
LB: loop body
LE: loop exit
PB: predicated region body
PF: predicated region fallthrough
CT: control target
= control target key end

     0   :  { %s1024_s0 = inlined_call_operand.vmem [shape: bf16[2,4,8,8], index: 0, kind: input, shape index: {}]   ;;  %s1025_s1 = inlined_call_operand.vmem [shape: bf16[2,4,8,8], index: 1, kind: input, shape index: {}]   ;;  %s1026_s2 = inlined_call_operand.vmem [shape: bf16[2,4,8,8], index: 2, kind: input, shape index: {}]   ;;  %s1027_s3 = inlined_call_operand.hbm [shape: f32[2,4,8,8], index: 3, kind: output, shape index: {0}]   ;;  %s1028_s4 = inlined_call_operand.vmem [shape: bf16[2,4,8,8], index: 4, kind: output, shape index: {1}]  }
   0x1   :  { %1029 = sst [smem:[#allocation5_spill]] %s1024_s0 }
   0x2   :  { %1030 = sst [smem:[#allocation6_spill]] %s1025_s1 }
   0x3   :  { %10 = vsyncpa [#allocation3], 0 }
   0x4   :  { %12 = vsyncpa [#allocation3 + $0x1], 0  ;;  %s879_s15 = smov 0   ;;  %s881_s16 = smov 0  }
   0x5   :  { %s883_s17 = smov 0   ;;  %s885_s18 = smov 0  }
   0x6   :  { %s887_s19 = smov 0   ;;  %s889_s20 = smov 0  }
   0x7   :  { %s891_s21 = smov 0   ;;  %s893_s22 = smov 0  }
   0x8 LB: > { %s643_s23 = sadd.s32 4294967295, %s849_s22   ;;  %s644_s24 = sadd.s32 4294967294, %s849_s22   ;;  %s849_s22 = sphi %s893_s22, %s18_s22   ;;  %s845_s21 = sphi %s891_s21, %s1041_s21   ;;  %s841_s20 = sphi %s889_s20, %s1040_s20   ;;  %s837_s19 = sphi %s887_s19, %s1039_s19   ;;  %s833_s18 = sphi %s885_s18, %s1038_s18   ;;  %s829_s17 = sphi %s883_s17, %s1037_s17   ;;  %s825_s16 = sphi %s881_s16, %s1036_s16   ;;  %s821_s15 = sphi %s879_s15, %s1035_s15  }
   0x9   : > { %s33_s25 = sadd.s32 1, %s841_s20  ;;  %s37_s26 = sadd.s32 1, %s845_s21 }
   0xa   : > { %p35_p0 = scmp.ge.s32.totalorder %s33_s25, 4  ;;  %p144_p1 = scmp.ne.s32.totalorder %s829_s17, %s825_s16 }
   0xb   : > { %p145_p2 = scmp.eq.s32.totalorder %s643_s23, 7  ;;  %p150_p5 = scmp.ne.s32.totalorder %s825_s16, %s821_s15 }
   0xc   : > { %s1043_s25 = smov (%p35_p0, %s33_s25), 0  ;;  %s1045_s26 = smov (!%p35_p0, %s37_s26), %s845_s21 }
   0xd   : > { %s128_s27 = ssub.s32 %s841_s20, %s1043_s25  ;;  %p930_p3 = por %p145_p2, %p144_p1 }
   0xe   : > { %p39_p4 = scmp.ge.s32.totalorder %s1045_s26, 2  ;;  %p151_p6 = scmp.eq.s32.totalorder %s644_s24, 7 }
   0xf   : > { %p647_p7 = scmp.ge.s32.totalorder %s849_s22, 1  ;;  %p235_p9 = scmp.lt.s32.totalorder %s849_s22, 9 }
  0x10   : > { %s1047_s26 = smov (%p39_p4, %s1045_s26), 0  ;;  %p939_p8 = por %p151_p6, %p150_p5 }
  0x11   : > { %s127_s30 = ssub.s32 %s845_s21, %s1047_s26  ;;  %s134_s5 = sadd.s32 1, %s829_s17 }
  0x12   : > { %s129_s6 = sor.u32 %s128_s27, %s127_s30  ;;  %p236_p10 = pnand %p647_p7, %p235_p9 }
  0x13   : > { %p132_p11 = scmp.eq.s32.totalorder %s129_s6, 0  ;;  %p294_p12 = scmp.lt.s32.totalorder (!%p236_p10), %s837_s19, 1 }
  0x14   : > { %239 = sbr.rel (%p236_p10) target bundleno = 746 (0x2ea), region = 32  ;;  %p296_p13 = scmp.lt.s32.totalorder (!%p236_p10), %s833_s18, 3 }
  0x15   : > { %s948_s7 = scalar_select %p132_p11, %s829_s17, %s134_s5  }
  0x16   : > { %s1033_s1 = sld [smem:[#allocation6_spill]] (!%p236_p10)  ;;  %s660_s13 = sshll.u32 (!%p236_p10), %s837_s19, 2 }
  0x17   : > { %s1034_s0 = sld [smem:[#allocation5_spill]] (!%p236_p10)  ;;  %s472_s14 = sadd.s32 (!%p236_p10), %s833_s18, %s660_s13 }
  0x19   : > { %v851_v0 = vmov 0.0   ;;  %vm852_vm0 = vmmov 0   ;;  %s295_s8 = scalar_select %p294_p12, %s837_s19, 1  ;;  %vm337_vm1 = vcmask 64512   ;;  %vm401_vm2 = vcmask 1043456  }
  0x1a   : > { %668 = vmatprep.subr.bf16.mxu0 %v851_v0  ;;  %670 = vmatprep.mubr.msk.bf16.mxu0 %vm852_vm0, %v851_v0  ;;  %s297_s9 = scalar_select %p296_p13, %s833_s18, 3 }
  0x1b   : > { %674 = vmatprep.subr.bf16.mxu1 %v851_v0  ;;  %676 = vmatprep.mubr.msk.bf16.mxu1 %vm852_vm0, %v851_v0  ;;  %s649_s10 = sshll.u32 %s295_s8, 2 }
  0x1c   : > { %s302_s11 = sadd.s32 %s649_s10, %s297_s9  ;;  %s278_s9 = sand.u32 1, %s825_s16  }
  0x1d   : > { %s954_s12 = sshll.u32 %s302_s11, 2  ;;  %s648_s10 = sshll.u32 %s278_s9, 3 }
  0x1e   : > { %s312_s23 = scalar_lea.vmem %s1033_s1, %s954_s12  ;;  %s304_s30 = scalar_lea.vmem %s1034_s0, %s954_s12 }
  0x1f   : > { %v336_v1 = vld [vmem:[%s312_s23] sm:$0xf]  ;;  %s320_s8 = scalar_lea.vmem %s1026_s2, %s954_s12  ;;  %s280_s11 = scalar_lea.vmem [#allocation2], %s648_s10 }
  0x20   : > { %v342_v2 = vsel %vm337_vm1, %v336_v1, 0  ;;  %v334_v3 = vld [vmem:[%s304_s30] sm:$0xf]  ;;  %s661_s23 = sshll.u32 %s472_s14, 7  ;;  %s476_s24 = sshll.u32 %s280_s11, 4  ;;  %s477_s24 = int_to_ptr.vmem [resolvable:$true] %s476_s24 }
  0x21   : > { %669 = vmatpush3.bf16.xpose.msra.mxu0 %v342_v2  ;;  %v335_v4 = vmul.bf16 1054293719, %v334_v3  ;;  %v397_v15 = vld [vmem:[%s320_s8] sm:$0xf]  ;;  %s474_s5 = scalar_lea.hbm %s1027_s3, %s661_s23  ;;  %s449_s6 = scalar_lea.sflag [#allocation3], %s278_s9 }
  0x22   : > { %v403_v16 = vsel %vm401_vm2, %v397_v15, 0  ;;  %s757_s8 = scalar_lea.vmem %s477_s24, 128  ;;  %s853_s10 = smov [#allocation2]  }
  0x23   : > { %675 = vmatpush3.bf16.msra.mxu1 %v403_v16  ;;  %p758_p0 = scmp.ne.s32.totalorder %s477_s24, %s757_s8  ;;  %s761_s0 = sshll.u32 %s853_s10, 4  ;;  %s762_s0 = int_to_ptr.vmem [resolvable:$false] %s761_s0 }
  0x24   : > { %s763_s1 = scalar_lea.vmem %s762_s0, 256  ;;  %p764_p4 = scmp.lt.s32.totalorder %s477_s24, %s762_s0 }
  0x25   : > { %p759_p1 = pnand %p758_p0, %p930_p3  ;;  %p765_p5 = scmp.lt.s32.totalorder %s763_s1, %s757_s8 }
  0x27   : > { %p760_p2 = pneg %p759_p1  ;;  %p766_p6 = por %p765_p5, %p764_p4 }
  0x28   : > { %671 = vmatmul.mubr.msk.bf16.vlgmr.msra.gmra.mxu0 %vm337_vm1, %v335_v4 }
  0x29   : > { %p767_p7 = pnand %p766_p6, %p760_p2 }
  0xe8   : > { %v378_v5 = vpop.f32.mrf.mxu0 }
  0xe9   : > { %v384_v6 = vsel %vm337_vm1, %v378_v5, -inf }
  0xea   : > { %385 = vmax.xlane.f32.xlu0 %v384_v6  ;;  %v672_v7 = vpop.f32.mrf.mxu0 }
  0xec   : > { %v381_v8 = vpop.f32.mrf.mxu0 }
  0xee   : > { %v673_v9 = vpop.f32.mrf.mxu0 }
 0x173   : > { %v386_v10 = vpop.xlane.xlu0 %385 }
 0x174   : > { %v387_v11 = vsub.f32 %v378_v5, %v386_v10 }
 0x176   : > { %v388_v12 = vmul.f32 1.442695, %v387_v11 }
 0x178   : > { %753 = vpow2.f32 %v388_v12 }
 0x185   : > { %v754_v13 = vpop.eup %753 }
 0x186   : > { %v390_v14 = vsel %vm337_vm1, %v754_v13, 0.0 }
 0x187   : > { %391 = vadd.xlane.f32.xlu0 %v390_v14 }
 0x210   : > { %v392_v17 = vpop.xlane.xlu0 %391 }
 0x211   : > { %755 = vrcp.f32 %v392_v17 }
 0x21e   : > { %v756_v18 = vpop.eup %755 }
 0x21f   : > { %v394_v19 = vmul.f32 %v756_v18, %v754_v13 }
 0x221   : > { %v396_v20 = vpack.c.bf16 %v394_v19, %v394_v19  ;;  %395 = vst.msk [vmem:[%s280_s11] sm:$0xff] %vm337_vm1, %v394_v19 }
 0x223   : > { %677 = vmatmul.mubr.msk.bf16.vlgmr.msra.gmra.mxu1 %vm337_vm1, %v396_v20 }
 0x224   : > { %770 = shalt.err (!%p767_p7)
}
 0x225   : > { %s771_s18 = scalar_lea.hbm %s474_s5, 128  ;;  %s775_s11 = scalar_lea.hbm %s1027_s3, 1024 }
 0x226   : > { %p772_p9 = scmp.ne.s32.totalorder %s474_s5, %s771_s18  ;;  %p776_p12 = scmp.lt.s32.totalorder %s474_s5, %s1027_s3 }
 0x227   : > { %p777_p13 = scmp.lt.s32.totalorder %s775_s11, %s771_s18 }
 0x228   : > { %p773_p10 = pnand %p772_p9, %p930_p3 }
 0x229   : > { %p778_p0 = por %p777_p13, %p776_p12 }
 0x22a   : > { %p774_p11 = pneg %p773_p10 }
 0x22c   : > { %p779_p1 = pnand %p778_p0, %p774_p11 }
 0x22e   : > { %782 = shalt.err (!%p779_p1)
}
 0x22f   : > { %680 = dma.vmem_to_hbm [thread:$0]  (%p930_p3), %s477_s24, 128, %s474_s5, %s449_s6   ;;  %vm446_vm3 = vcmask 60416  }
 0x230   : > { %s331_s23 = scalar_lea.vmem %s1028_s4, %s954_s12 }
 0x2e3   : > { %v439_v21 = vpop.f32.mrf.mxu1 }
 0x2e4   : > { %v445_v22 = vpack.c.bf16 %v439_v21, %v439_v21 }
 0x2e5   : > { %v678_v23 = vpop.f32.mrf.mxu1 }
 0x2e6   : > { %447 = vst.msk [vmem:[%s331_s23] sm:$0xf] %vm446_vm3, %v445_v22 }
 0x2e7   : > { %v442_v24 = vpop.f32.mrf.mxu1 }
 0x2e9   : > { %v679_v25 = vpop.f32.mrf.mxu1 }
 0x2ea PF: > { %p686_p2 = scmp.ge.s32.totalorder %s849_s22, 2  ;;  %s491_s27 = sand.u32 1, %s821_s15  }
 0x2eb   : > { %s492_s28 = scalar_lea.sflag [#allocation3], %s491_s27 }
 0x2ec   : > { %p683_p4 = pnand %p686_p2, %p939_p8 }
 0x2ee   : > { %p684_p3 = pneg %p683_p4 }
 0x2f0   : > { %816 = dma.done.wait (%p684_p3), %s492_s28, 128  }
 0x2f1   : > { %818 = vsyncadd (%p684_p3), %s492_s28, 4294967168  ;;  %s18_s22 = sadd.s32 1, %s849_s22   ;;  %s1035_s15 = smov %s825_s16 }
 0x2f2   : > { %p15_p5 = scmp.ge.s32.totalorder %s18_s22, 10   ;;  %s1036_s16 = smov %s829_s17 }
 0x2f3   : > { %s1037_s17 = smov %s948_s7  ;;  %s1038_s18 = smov %s841_s20 }
 0x2f4   : > { %s1039_s19 = smov %s845_s21  ;;  %s1040_s20 = smov %s1043_s25 }
 0x2f5   : > { %s1041_s21 = smov %s1047_s26  ;;  %17 = sbr.rel (!%p15_p5) target bundleno = 8 (0x8), region = 85 }
 0x2fa   :  { %511 = vsyncpa [#allocation3], 1 }
 0x2fb   :  { %513 = vsyncpa [#allocation3 + $0x1], 1 }

// kernel: multi_head_attention.9
= control target key start
LH: loop header
LB: loop body
LE: loop exit
PB: predicated region body
PF: predicated region fallthrough
CT: control target
= control target key end

     0   :  { %v175_v1 = vmov 0.0   ;;  %vm176_vm0 = vmmov 0   ;;  %vm20_vm1 = vcmask 261120   ;;  %s222_s0 = inlined_call_operand.vmem [shape: bf16[16,32], index: 0, kind: input, shape index: {}]   ;;  %s223_s1 = inlined_call_operand.vmem [shape: bf16[32,32], index: 1, kind: input, shape index: {}]   ;;  %s224_s2 = inlined_call_operand.vmem [shape: f32[1,32], index: 2, kind: input, shape index: {}]   ;;  %s225_s3 = inlined_call_operand.hbm [shape: f32[16,32], index: 3, kind: output, shape index: {}]  }
   0x1   :  { %v150_v0 = vld [vmem:[%s223_s1 + $0x8] sm:$0xff]   ;;  %137 = vmatprep.subr.bf16.mxu0 %v175_v1  ;;  %v151_v2 = vld [vmem:[%s223_s1] sm:$0xff]   ;;  %141 = vmatprep.mubr.msk.bf16.mxu0 %vm176_vm0, %v175_v1  ;;  %21 = vst.msk [vmem:[#allocation2] sm:$0xff] %vm20_vm1, %v175_v1  ;;  %22 = vst.msk [vmem:[#allocation2 + $0x8] sm:$0xff] %vm20_vm1, %v175_v1 }
   0x2   :  { %138 = vmatpush3.bf16.msra.mxu0 %v150_v0 }
   0x3   :  { %139 = vmatprep.subr.bf16.mxu0 %v175_v1 }
   0x4   :  { %8 = vsyncpa [#allocation4], 0  ;;  %v152_v3 = vld [vmem:[%s222_s0] sm:$0xff]   ;;  %s177_s0 = smov [#allocation3]  }
   0x5   :  { %v133_v12 = vld [vmem:[%s224_s2] ss:$0 sm:$0xff]  ;;  %s118_s19 = sshll.u32 %s177_s0, 4  ;;  %s119_s19 = int_to_ptr.vmem [resolvable:$true] %s118_s19 }
   0x6   :  { %140 = vmatpush3.bf16.msra.mxu0 %v151_v2  ;;  %s153_s20 = scalar_lea.vmem %s119_s19, 256  ;;  %p158_p1 = scmp.lt.s32.totalorder %s119_s19, %s119_s19 }
   0x7   :  { %p154_p0 = scmp.ne.s32.totalorder %s119_s19, %s153_s20  ;;  %p159_p2 = scmp.lt.s32.totalorder %s153_s20, %s153_s20 }
   0x8   :  { %v23_v4 = vld [vmem:[#allocation2] sm:$0xff]  ;;  %v24_v8 = vld [vmem:[#allocation2 + $0x8] sm:$0xff] }
   0x9   :  { %142 = vmatmul.mubr.msk.bf16.vlgmr.msra.gmra.mxu0 %vm20_vm1, %v152_v3  ;;  %p160_p3 = por %p159_p2, %p158_p1 }
   0xb   :  { %p161_p4 = pnand %p160_p3, %p154_p0 }
  0xc9   :  { %v86_v5 = vpop.f32.mrf.mxu0 }
  0xca   :  { %v93_v6 = vadd.f32 %v86_v5, %v23_v4 }
  0xcb   :  { %v143_v7 = vpop.f32.mrf.mxu0 }
  0xcc   :  { %95 = vst.msk [vmem:[#allocation2] sm:$0xff] %vm20_vm1, %v93_v6 }
  0xcd   :  { %v89_v9 = vpop.f32.mrf.mxu0 }
  0xce   :  { %v94_v10 = vadd.f32 %v89_v9, %v24_v8 }
  0xcf   :  { %v144_v11 = vpop.f32.mrf.mxu0 }
  0xd0   :  { %96 = vst.msk [vmem:[#allocation2 + $0x8] sm:$0xff] %vm20_vm1, %v94_v10 }
  0xd3   :  { %v100_v13 = vld [vmem:[#allocation2] sm:$0xff] }
  0xd4   :  { %v109_v14 = vadd.f32 %v133_v12, %v100_v13 }
  0xd6   :  { %111 = vst.msk [vmem:[#allocation3] sm:$0xff] %vm20_vm1, %v109_v14 }
  0xd7   :  { %v101_v15 = vld [vmem:[#allocation2 + $0x8] sm:$0xff] }
  0xd8   :  { %v110_v16 = vadd.f32 %v133_v12, %v101_v15 }
  0xda   :  { %112 = vst.msk [vmem:[#allocation3 + $0x8] sm:$0xff] %vm20_vm1, %v110_v16 }
  0xdb   :  { %164 = shalt.err (!%p161_p4)
}
  0xdc   :  { %s178_s21 = smov 128   ;;  %s179_s2 = smov 8  }
  0xdd   :  { %124 = dma.vmem_to_hbm [thread:$0]  %s119_s19, 256, %s225_s3, [#allocation4], %s178_s21, %s178_s21, %s179_s2  }
  0xde   :  { %173 = dma.done.wait [#allocation4], 256  }
  0xdf   :  { %174 = vsyncadd [#allocation4], 4294967040 }
  0xe0   :  { %128 = vsyncpa [#allocation4], 1 }

</bundles_post_ra>
